<compile_context>
chip_gen: v6e
topology: v6e:2x2x1
jax: 0.10.0
libtpu: 0.0.40
codegen_flags: <defaults>
</compile_context>

<pallas_src>
import functools
import math

import jax
import jax.numpy as jnp
from jax.experimental import pallas as pl
from jax.experimental.pallas import tpu as pltpu

_LANE = 128          # lane width: feature dims zero-padded to multiples of this
_BATCH_ALIGN = 16    # batch padded to multiples of 16 (bf16 sublane packing)
_TM_MAX = 1024       # batch-tile upper bound (review: 512-2048 is the sweet spot)


def _round_up(n, m):
    return ((n + m - 1) // m) * m


def _vmem_limit_bytes():
    """Generation-aware scoped-VMEM limit: v5e/v6e have 128 MiB physical VMEM,
    v7x only 64 MiB, so one constant must not be shared across generations."""
    try:
        cap = int(pltpu.get_tpu_info().vmem_capacity_bytes)
    except Exception:
        cap = 64 * 1024 * 1024  # conservative fallback (v7x-sized)
    return int(min(cap * 3 // 4, 100 * 1024 * 1024))


def _mlp_fused_kernel(*refs, num_layers):
    """Fused MLP: refs = (x_ref, w0, b0, w1, b1, ..., o_ref).

    Weights are (Din_pad, Dout_pad) bf16 (pre-transposed + zero padded), biases are
    (1, Dout_pad) f32.  Hidden layers: Linear + ReLU.  Last layer: Linear + softmax
    over dim=1; its padded class lanes were pre-masked to -1e30 via the stored bias
    (padded weight columns are zero), so exp() of those lanes is exactly 0 and no
    per-tile iota/where is needed here.
    """
    x_ref = refs[0]
    o_ref = refs[-1]
    wb = refs[1:-1]

    h = x_ref[...].astype(jnp.float32)                        # (TM, Din_pad) f32
    for i in range(num_layers):
        w = wb[2 * i][...]                                    # (Din_pad, Dout_pad) bf16
        b = wb[2 * i + 1][...].astype(jnp.float32)            # (1, Dout_pad) f32
        # MXU in native bf16, accumulate in f32; epilogue stays f32 (v5e-safe).
        h = jnp.dot(h.astype(jnp.bfloat16), w,
                    preferred_element_type=jnp.float32) + b
        if i < num_layers - 1:
            h = jnp.maximum(h, 0.0)                           # ReLU
        else:
            # Numerically-stable softmax over dim=1 with exact normalization.
            m = jnp.max(h, axis=1, keepdims=True)
            e = jnp.exp(h - m)
            denom = jnp.sum(e, axis=1, keepdims=True)
            h = e / denom
    o_ref[...] = h.astype(o_ref.dtype)


def init_mlp_params(key, input_size, hidden_sizes, num_classes):
    """PyTorch-style params: nn.Linear default init U(-1/sqrt(fan_in), 1/sqrt(fan_in)).
    Weights stored (out, in), biases (out,)."""
    params = []
    prev = input_size
    dims = list(hidden_sizes) + [num_classes]
    for d in dims:
        key, kw, kb = jax.random.split(key, 3)
        bound = 1.0 / math.sqrt(prev)
        w = jax.random.uniform(kw, (d, prev), jnp.float32, -bound, bound)
        b = jax.random.uniform(kb, (d,), jnp.float32, -bound, bound)
        params.append((w, b))
        prev = d
    return params


def prepare_params(params):
    """One-time (off the hot path):
      * transpose weights (out,in)->(in,out), zero-pad feature dims to multiples of 128,
        and store them as bf16 (halves weight DMA bytes, feeds the MXU native bf16 mode);
      * biases reshaped to (1, out_pad) and kept f32 (negligible bytes, exact epilogue);
      * the LAST layer's padded class lanes get a large finite negative bias (-1e30),
        baking the softmax mask into the bias (padded weight columns are zero, so the
        padded logits equal the bias)."""
    prepared = []
    n = len(params)
    for li, (w, b) in enumerate(params):
        dout, din = w.shape
        din_pad = _round_up(din, _LANE)
        dout_pad = _round_up(dout, _LANE)
        w_t = jnp.zeros((din_pad, dout_pad), jnp.float32).at[:din, :dout].set(w.T)
        w_t = w_t.astype(jnp.bfloat16)
        pad_fill = -1e30 if li == n - 1 else 0.0
        b2 = jnp.full((1, dout_pad), pad_fill, jnp.float32).at[0, :dout].set(b)
        prepared.append((w_t, b2))
    return prepared


def mlp_forward(x, prepared_params, num_classes):
    """x: (B, input_size) f32. Returns (B, num_classes) softmax probabilities (f32)."""
    B, Din = x.shape
    num_layers = len(prepared_params)
    din_pad = prepared_params[0][0].shape[0]
    dout_pad = prepared_params[-1][0].shape[1]

    # Batch tiling: pad to a bf16-packing-friendly multiple of 16.  Small batches run
    # as a single tile; larger batches use big tiles (amortizes ~0.35 us/step overhead
    # and keeps DMA near roofline) while always producing a grid of length >= 2 so the
    # "parallel" axis shards across v7x's two TensorCores.
    B_pad = _round_up(max(B, 1), _BATCH_ALIGN)
    if B_pad <= 256:
        TM = B_pad
    else:
        TM = min(_TM_MAX, _round_up(pl.cdiv(B_pad, 2), _BATCH_ALIGN))
        B_pad = _round_up(B_pad, TM)
    grid = (B_pad // TM,)

    x_p = jnp.zeros((B_pad, din_pad), x.dtype).at[:B, :Din].set(x)

    # TODO(synk): if total resident weight bytes exceed ~half of
    # pltpu.get_tpu_info().vmem_capacity_bytes (realistic on v7x's 64 MiB VMEM for
    # hidden widths ~4k), fall back to a K/N-tiled path (extra 'arbitrary' grid axis
    # + VMEM accumulator) instead of keeping all weights fully VMEM-resident.

    flat_wb = []
    in_specs = [pl.BlockSpec((TM, din_pad), lambda i: (i, 0), memory_space=pltpu.VMEM)]
    for w, b in prepared_params:
        flat_wb.extend([w, b])
        # Grid-invariant operands (index_map is constant): single-buffer them —
        # default double-buffering would be pure VMEM waste.
        in_specs.append(pl.BlockSpec(w.shape, lambda i: (0, 0),
                                     memory_space=pltpu.VMEM,
                                     pipeline_mode=pl.Buffered(1)))
        in_specs.append(pl.BlockSpec(b.shape, lambda i: (0, 0),
                                     memory_space=pltpu.VMEM,
                                     pipeline_mode=pl.Buffered(1)))

    kernel = functools.partial(_mlp_fused_kernel, num_layers=num_layers)

    out_pad = pl.pallas_call(
        kernel,
        out_shape=jax.ShapeDtypeStruct((B_pad, dout_pad), x.dtype),
        grid=grid,
        in_specs=in_specs,
        out_specs=pl.BlockSpec((TM, dout_pad), lambda i: (i, 0), memory_space=pltpu.VMEM),
        compiler_params=pltpu.CompilerParams(
            dimension_semantics=("parallel",),
            vmem_limit_bytes=_vmem_limit_bytes(),
        ),
    )(x_p, *flat_wb)

    return out_pad[:B, :num_classes]


if __name__ == "__main__":
    # Small shapes consistent with the module: batch=8, input=16, hidden=[32, 32], classes=10
    batch, input_size, hidden_sizes, num_classes = 8, 16, [32, 32], 10

    key = jax.random.PRNGKey(0)
    key, kx = jax.random.split(key)
    x = jax.random.normal(kx, (batch, input_size), jnp.float32)

    params = init_mlp_params(key, input_size, hidden_sizes, num_classes)
    prepared = prepare_params(params)   # one-time, off the hot path

    out = jax.block_until_ready(mlp_forward(x, prepared, num_classes))

    # Pure-JAX (f32) reference of the PyTorch forward for correctness.
    def ref_forward(xv):
        h = xv
        for i, (w, b) in enumerate(params):
            h = h @ w.T + b
            if i < len(params) - 1:
                h = jnp.maximum(h, 0.0)
        return jax.nn.softmax(h, axis=1)

    ref = ref_forward(x)
    assert out.shape == (batch, num_classes)
    assert bool(jnp.all(jnp.isfinite(out)))
    # Exact divide in the kernel -> rows sum to 1 tightly.
    assert bool(jnp.allclose(jnp.sum(out, axis=1), 1.0, atol=1e-5))
    # bf16 weights/activations in the matmul -> modest tolerance vs the f32 reference.
    assert bool(jnp.allclose(out, ref, atol=2e-2, rtol=2e-2))

    # Exercise the multi-tile (grid >= 2) path with a larger, non-aligned batch.
    key, kx2 = jax.random.split(key)
    x2 = jax.random.normal(kx2, (500, input_size), jnp.float32)
    out2 = jax.block_until_ready(mlp_forward(x2, prepared, num_classes))
    ref2 = ref_forward(x2)
    assert out2.shape == (500, num_classes)
    assert bool(jnp.all(jnp.isfinite(out2)))
    assert bool(jnp.allclose(jnp.sum(out2, axis=1), 1.0, atol=1e-5))
    assert bool(jnp.allclose(out2, ref2, atol=2e-2, rtol=2e-2))

    print("KERNEL_OK")
</pallas_src>

<mosaic_0001>
module attributes {stable_mosaic.version = 11 : i64} {
  func.func @_mlp_fused_kernel(%arg0: i32, %arg1: memref<16x128xf32, #tpu.memory_space<vmem>>, %arg2: memref<128x128xbf16, #tpu.memory_space<vmem>>, %arg3: memref<1x128xf32, #tpu.memory_space<vmem>>, %arg4: memref<128x128xbf16, #tpu.memory_space<vmem>>, %arg5: memref<1x128xf32, #tpu.memory_space<vmem>>, %arg6: memref<128x128xbf16, #tpu.memory_space<vmem>>, %arg7: memref<1x128xf32, #tpu.memory_space<vmem>>, %arg8: memref<16x128xf32, #tpu.memory_space<vmem>>) attributes {dimension_semantics = [#tpu.dimension_semantics<parallel>], iteration_bounds = array<i64: 1>, scalar_prefetch = 0 : i64, scratch_operands = 0 : i64, tpu.core_type = #tpu.core_type<tc>, window_params = [{transform_indices = @transform_0, window_bounds = array<i64: 16, 128>}, {pipeline_mode = #tpu.pipeline_mode<synchronous>, transform_indices = @transform_1, window_bounds = array<i64: 128, 128>}, {pipeline_mode = #tpu.pipeline_mode<synchronous>, transform_indices = @transform_2, window_bounds = array<i64: 1, 128>}, {pipeline_mode = #tpu.pipeline_mode<synchronous>, transform_indices = @transform_3, window_bounds = array<i64: 128, 128>}, {pipeline_mode = #tpu.pipeline_mode<synchronous>, transform_indices = @transform_4, window_bounds = array<i64: 1, 128>}, {pipeline_mode = #tpu.pipeline_mode<synchronous>, transform_indices = @transform_5, window_bounds = array<i64: 128, 128>}, {pipeline_mode = #tpu.pipeline_mode<synchronous>, transform_indices = @transform_6, window_bounds = array<i64: 1, 128>}, {transform_indices = @transform_7, window_bounds = array<i64: 16, 128>}]} {
    %c0 = arith.constant 0 : index
    %c0_0 = arith.constant 0 : index
    %0 = vector.load %arg1[%c0, %c0_0] : memref<16x128xf32, #tpu.memory_space<vmem>>, vector<16x128xf32>
    %c0_1 = arith.constant 0 : index
    %c0_2 = arith.constant 0 : index
    %1 = vector.load %arg2[%c0_1, %c0_2] : memref<128x128xbf16, #tpu.memory_space<vmem>>, vector<128x128xbf16>
    %c0_3 = arith.constant 0 : index
    %c0_4 = arith.constant 0 : index
    %2 = vector.load %arg3[%c0_3, %c0_4] : memref<1x128xf32, #tpu.memory_space<vmem>>, vector<1x128xf32>
    %3 = arith.truncf %0 : vector<16x128xf32> to vector<16x128xbf16>
    %cst = arith.constant dense<0.000000e+00> : vector<16x128xf32>
    %4 = tpu.matmul %3, %1, %cst {dimension_numbers = #tpu.dot_dimension_numbers<[1], [0], [0], [1], [0, 0, 1, 1], [], []>} : vector<16x128xbf16>, vector<128x128xbf16>, vector<16x128xf32> -> vector<16x128xf32>
    %5 = vector.broadcast %2 : vector<1x128xf32> to vector<16x128xf32>
    %6 = arith.addf %4, %5 : vector<16x128xf32>
    %cst_5 = arith.constant 0.000000e+00 : f32
    %7 = vector.broadcast %cst_5 : f32 to vector<16x128xf32>
    %8 = arith.maximumf %6, %7 : vector<16x128xf32>
    %c0_6 = arith.constant 0 : index
    %c0_7 = arith.constant 0 : index
    %9 = vector.load %arg4[%c0_6, %c0_7] : memref<128x128xbf16, #tpu.memory_space<vmem>>, vector<128x128xbf16>
    %c0_8 = arith.constant 0 : index
    %c0_9 = arith.constant 0 : index
    %10 = vector.load %arg5[%c0_8, %c0_9] : memref<1x128xf32, #tpu.memory_space<vmem>>, vector<1x128xf32>
    %11 = arith.truncf %8 : vector<16x128xf32> to vector<16x128xbf16>
    %cst_10 = arith.constant dense<0.000000e+00> : vector<16x128xf32>
    %12 = tpu.matmul %11, %9, %cst_10 {dimension_numbers = #tpu.dot_dimension_numbers<[1], [0], [0], [1], [0, 0, 1, 1], [], []>} : vector<16x128xbf16>, vector<128x128xbf16>, vector<16x128xf32> -> vector<16x128xf32>
    %13 = vector.broadcast %10 : vector<1x128xf32> to vector<16x128xf32>
    %14 = arith.addf %12, %13 : vector<16x128xf32>
    %cst_11 = arith.constant 0.000000e+00 : f32
    %15 = vector.broadcast %cst_11 : f32 to vector<16x128xf32>
    %16 = arith.maximumf %14, %15 : vector<16x128xf32>
    %c0_12 = arith.constant 0 : index
    %c0_13 = arith.constant 0 : index
    %17 = vector.load %arg6[%c0_12, %c0_13] : memref<128x128xbf16, #tpu.memory_space<vmem>>, vector<128x128xbf16>
    %c0_14 = arith.constant 0 : index
    %c0_15 = arith.constant 0 : index
    %18 = vector.load %arg7[%c0_14, %c0_15] : memref<1x128xf32, #tpu.memory_space<vmem>>, vector<1x128xf32>
    %19 = arith.truncf %16 : vector<16x128xf32> to vector<16x128xbf16>
    %cst_16 = arith.constant dense<0.000000e+00> : vector<16x128xf32>
    %20 = tpu.matmul %19, %17, %cst_16 {dimension_numbers = #tpu.dot_dimension_numbers<[1], [0], [0], [1], [0, 0, 1, 1], [], []>} : vector<16x128xbf16>, vector<128x128xbf16>, vector<16x128xf32> -> vector<16x128xf32>
    %21 = vector.broadcast %18 : vector<1x128xf32> to vector<16x128xf32>
    %22 = arith.addf %20, %21 : vector<16x128xf32>
    %cst_17 = arith.constant dense<0xFF800000> : vector<16xf32>
    %23 = vector.multi_reduction <maximumf>, %22, %cst_17 [1] : vector<16x128xf32> to vector<16xf32>
    %24 = vector.shape_cast %23 : vector<16xf32> to vector<16x1xf32>
    %25 = vector.broadcast %24 : vector<16x1xf32> to vector<16x128xf32>
    %26 = arith.subf %22, %25 : vector<16x128xf32>
    %27 = math.exp %26 : vector<16x128xf32>
    %cst_18 = arith.constant dense<0.000000e+00> : vector<16xf32>
    %28 = vector.multi_reduction <add>, %27, %cst_18 [1] : vector<16x128xf32> to vector<16xf32>
    %29 = vector.shape_cast %28 : vector<16xf32> to vector<16x1xf32>
    %30 = vector.broadcast %29 : vector<16x1xf32> to vector<16x128xf32>
    %31 = arith.divf %27, %30 : vector<16x128xf32>
    %c0_19 = arith.constant 0 : index
    %c0_20 = arith.constant 0 : index
    %32 = vector.load %arg8[%c0_19, %c0_20] : memref<16x128xf32, #tpu.memory_space<vmem>>, vector<16x128xf32>
    tpu.vector_store %arg8[%c0_19, %c0_20], %31 {strides = array<i32>} : memref<16x128xf32, #tpu.memory_space<vmem>>, vector<16x128xf32>,
    return
  }
  func.func @transform_0(%arg0: i32) -> (i32, i32) {
    %c0_i32 = arith.constant 0 : i32
    %c0_i32_0 = arith.constant 0 : i32
    return %arg0, %c0_i32 : i32, i32
  }
  func.func @transform_1(%arg0: i32) -> (i32, i32) {
    %c0_i32 = arith.constant 0 : i32
    %c0_i32_0 = arith.constant 0 : i32
    %c0_i32_1 = arith.constant 0 : i32
    return %c0_i32, %c0_i32_0 : i32, i32
  }
  func.func @transform_2(%arg0: i32) -> (i32, i32) {
    %c0_i32 = arith.constant 0 : i32
    %c0_i32_0 = arith.constant 0 : i32
    %c0_i32_1 = arith.constant 0 : i32
    return %c0_i32, %c0_i32_0 : i32, i32
  }
  func.func @transform_3(%arg0: i32) -> (i32, i32) {
    %c0_i32 = arith.constant 0 : i32
    %c0_i32_0 = arith.constant 0 : i32
    %c0_i32_1 = arith.constant 0 : i32
    return %c0_i32, %c0_i32_0 : i32, i32
  }
  func.func @transform_4(%arg0: i32) -> (i32, i32) {
    %c0_i32 = arith.constant 0 : i32
    %c0_i32_0 = arith.constant 0 : i32
    %c0_i32_1 = arith.constant 0 : i32
    return %c0_i32, %c0_i32_0 : i32, i32
  }
  func.func @transform_5(%arg0: i32) -> (i32, i32) {
    %c0_i32 = arith.constant 0 : i32
    %c0_i32_0 = arith.constant 0 : i32
    %c0_i32_1 = arith.constant 0 : i32
    return %c0_i32, %c0_i32_0 : i32, i32
  }
  func.func @transform_6(%arg0: i32) -> (i32, i32) {
    %c0_i32 = arith.constant 0 : i32
    %c0_i32_0 = arith.constant 0 : i32
    %c0_i32_1 = arith.constant 0 : i32
    return %c0_i32, %c0_i32_0 : i32, i32
  }
  func.func @transform_7(%arg0: i32) -> (i32, i32) {
    %c0_i32 = arith.constant 0 : i32
    %c0_i32_0 = arith.constant 0 : i32
    return %arg0, %c0_i32 : i32, i32
  }
}

</mosaic_0001>

<bundles_post_ra>
// kernel: tpu_custom_call.1
= control target key start
LH: loop header
LB: loop body
LE: loop exit
PB: predicated region body
PF: predicated region fallthrough
CT: control target
= control target key end

     0   :  { %12 = vsyncpa [#allocation3], 0  ;;  %s852_s0 = inlined_call_operand.hbm [shape: f32[16,128], index: 0, kind: input, shape index: {}]   ;;  %s853_s1 = inlined_call_operand.hbm [shape: bf16[128,128], index: 1, kind: input, shape index: {}]   ;;  %s854_s2 = inlined_call_operand.vmem [shape: f32[1,128], index: 2, kind: input, shape index: {}]   ;;  %s855_s3 = inlined_call_operand.hbm [shape: bf16[128,128], index: 3, kind: input, shape index: {}]   ;;  %s856_s4 = inlined_call_operand.vmem [shape: f32[1,128], index: 4, kind: input, shape index: {}]   ;;  %s857_s5 = inlined_call_operand.hbm [shape: bf16[128,128], index: 5, kind: input, shape index: {}]   ;;  %s858_s6 = inlined_call_operand.vmem [shape: f32[1,128], index: 6, kind: input, shape index: {}]   ;;  %s859_s7 = inlined_call_operand.hbm [shape: f32[16,128], index: 7, kind: output, shape index: {}]  }
   0x1   :  { %13 = vsyncpa [#allocation6], 0 }
   0x2   :  { %14 = vsyncpa [#allocation9], 0 }
   0x3   :  { %15 = vsyncpa [#allocation4], 0  ;;  %s732_s24 = smov [#allocation5]  }
   0x4   :  { %s33_s25 = sshll.u32 %s732_s24, 4  ;;  %s34_s25 = int_to_ptr.vmem [resolvable:$true] %s33_s25 }
   0x5   :  { %s632_s26 = scalar_lea.vmem %s34_s25, 1024  ;;  %p637_p1 = scmp.lt.s32.totalorder %s34_s25, %s34_s25 }
   0x6   :  { %p633_p0 = scmp.ne.s32.totalorder %s34_s25, %s632_s26  ;;  %p638_p2 = scmp.lt.s32.totalorder %s632_s26, %s632_s26 }
   0x8   :  { %p639_p3 = por %p638_p2, %p637_p1 }
   0xa   :  { %p640_p4 = pnand %p639_p3, %p633_p0 }
   0xc   :  { %643 = shalt.err (!%p640_p4)
}
   0xd   :  { %s733_s27 = smov 64   ;;  %s734_s28 = smov 4  }
   0xe   :  { %39 = dma.hbm_to_vmem [thread:$0]  %s853_s1, 1024, %s34_s25, [#allocation6], %s733_s27, %s733_s27, %s734_s28  }
   0xf   :  { %s735_s8 = smov [#allocation2]  }
  0x10   :  { %s21_s9 = sshll.u32 %s735_s8, 4  ;;  %s22_s9 = int_to_ptr.vmem [resolvable:$true] %s21_s9 }
  0x11   :  { %s652_s10 = scalar_lea.vmem %s22_s9, 256  ;;  %p657_p6 = scmp.lt.s32.totalorder %s22_s9, %s22_s9 }
  0x12   :  { %p653_p5 = scmp.ne.s32.totalorder %s22_s9, %s652_s10  ;;  %p658_p7 = scmp.lt.s32.totalorder %s652_s10, %s652_s10 }
  0x14   :  { %p659_p8 = por %p658_p7, %p657_p6 }
  0x16   :  { %p660_p9 = pnand %p659_p8, %p653_p5 }
  0x18   :  { %663 = shalt.err (!%p660_p9)
}
  0x19   :  { %s736_s11 = smov 128   ;;  %s737_s12 = smov 8  }
  0x1a   :  { %27 = dma.hbm_to_vmem [thread:$0]  %s852_s0, 256, %s22_s9, [#allocation3], %s736_s11, %s736_s11, %s737_s12  }
  0x1b   :  { %s738_s1 = smov [#allocation7]   ;;  %s739_s16 = smov [#allocation8]  }
  0x1c   :  { %s47_s15 = sshll.u32 %s738_s1, 4  ;;  %s61_s17 = sshll.u32 %s739_s16, 4  ;;  %s48_s15 = int_to_ptr.vmem [resolvable:$true] %s47_s15  ;;  %s62_s17 = int_to_ptr.vmem [resolvable:$true] %s61_s17 }
  0x1d   :  { %s672_s18 = scalar_lea.vmem %s48_s15, 1024  ;;  %p677_p11 = scmp.lt.s32.totalorder %s48_s15, %s48_s15 }
  0x1e   :  { %p673_p10 = scmp.ne.s32.totalorder %s48_s15, %s672_s18  ;;  %p678_p12 = scmp.lt.s32.totalorder %s672_s18, %s672_s18 }
  0x20   :  { %p679_p13 = por %p678_p12, %p677_p11 }
  0x22   :  { %p680_p0 = pnand %p679_p13, %p673_p10 }
  0x24   :  { %683 = shalt.err (!%p680_p0)
}
  0x25   :  { %53 = dma.hbm_to_vmem [thread:$0]  %s855_s3, 1024, %s48_s15, [#allocation6], %s733_s27, %s733_s27, %s734_s28  }
  0x26   :  { %s692_s0 = scalar_lea.vmem %s62_s17, 1024  ;;  %p697_p2 = scmp.lt.s32.totalorder %s62_s17, %s62_s17 }
  0x27   :  { %p693_p1 = scmp.ne.s32.totalorder %s62_s17, %s692_s0  ;;  %p698_p3 = scmp.lt.s32.totalorder %s692_s0, %s692_s0 }
  0x29   :  { %p699_p4 = por %p698_p3, %p697_p2 }
  0x2b   :  { %p700_p5 = pnand %p699_p4, %p693_p1 }
  0x2d   :  { %703 = shalt.err (!%p700_p5)
}
  0x2e   :  { %67 = dma.hbm_to_vmem [thread:$0]  %s857_s5, 1024, %s62_s17, [#allocation9], %s733_s27, %s733_s27, %s734_s28  }
  0x2f   :  { %724 = dma.done.wait [#allocation3], 256  }
  0x30   :  { %725 = vsyncadd [#allocation3], 4294967040 }
  0x31   :  { %726 = dma.done.wait [#allocation6], 2048  }
  0x32   :  { %727 = vsyncadd [#allocation6], 4294965248 }
  0x33   :  { %728 = dma.done.wait [#allocation9], 1024  }
  0x34   :  { %729 = vsyncadd [#allocation9], 4294966272  ;;  %v740_v0 = vmov 0.0   ;;  %vm741_vm0 = vmmov 0   ;;  %v592_v1 = vld [vmem:[#allocation5 + $0x38] sm:$0xff]   ;;  %v593_v2 = vld [vmem:[#allocation5 + $0x30] sm:$0xff]  }
  0x35   :  { %521 = vmatprep.subr.bf16.mxu0 %v740_v0  ;;  %537 = vmatprep.mubr.msk.bf16.mxu0 %vm741_vm0, %v740_v0  ;;  %v594_v3 = vld [vmem:[#allocation5 + $0x28] sm:$0xff]   ;;  %v600_v4 = vld [vmem:[#allocation7 + $0x38] sm:$0xff]   ;;  %v595_v5 = vld [vmem:[#allocation5 + $0x20] sm:$0xff]  }
  0x36   :  { %541 = vmatprep.subr.bf16.mxu1 %v740_v0  ;;  %557 = vmatprep.mubr.msk.bf16.mxu1 %vm741_vm0, %v740_v0  ;;  %v601_v6 = vld [vmem:[#allocation7 + $0x30] sm:$0xff]   ;;  %v596_v7 = vld [vmem:[#allocation5 + $0x18] sm:$0xff]   ;;  %v602_v8 = vld [vmem:[#allocation7 + $0x28] sm:$0xff]  }
  0x37   :  { %522 = vmatpush3.bf16.msra.mxu0 %v592_v1  ;;  %542 = vmatpush3.bf16.msra.mxu1 %v600_v4  ;;  %v597_v9 = vld [vmem:[#allocation5 + $0x10] sm:$0xff]   ;;  %v603_v10 = vld [vmem:[#allocation7 + $0x20] sm:$0xff]   ;;  %v598_v11 = vld [vmem:[#allocation5 + $0x8] sm:$0xff]  }
  0x38   :  { %523 = vmatprep.subr.bf16.mxu0 %v740_v0  ;;  %543 = vmatprep.subr.bf16.mxu1 %v740_v0  ;;  %v604_v12 = vld [vmem:[#allocation7 + $0x18] sm:$0xff]   ;;  %v599_v13 = vld [vmem:[#allocation5] sm:$0xff]   ;;  %v83_v14 = vld [vmem:[#allocation2] sm:$0xff] }
  0x39   :  { %v84_v15 = vld [vmem:[#allocation2 + $0x8] sm:$0xff]  ;;  %v605_v17 = vld [vmem:[#allocation7 + $0x10] sm:$0xff]   ;;  %v606_v18 = vld [vmem:[#allocation7 + $0x8] sm:$0xff]  }
  0x3a   :  { %v102_v16 = vpack.c.bf16 %v84_v15, %v83_v14  ;;  %v607_v19 = vld [vmem:[#allocation7] sm:$0xff]   ;;  %v608_v20 = vld [vmem:[#allocation8 + $0x38] sm:$0xff]   ;;  %v609_v21 = vld [vmem:[#allocation8 + $0x30] sm:$0xff]  }
  0x3b   :  { %524 = vmatpush3.bf16.msra.mxu0 %v593_v2  ;;  %544 = vmatpush3.bf16.msra.mxu1 %v601_v6  ;;  %v610_v22 = vld [vmem:[#allocation8 + $0x28] sm:$0xff]   ;;  %v611_v23 = vld [vmem:[#allocation8 + $0x20] sm:$0xff]   ;;  %v612_v24 = vld [vmem:[#allocation8 + $0x18] sm:$0xff]  }
  0x3c   :  { %525 = vmatprep.subr.bf16.mxu0 %v740_v0  ;;  %545 = vmatprep.subr.bf16.mxu1 %v740_v0  ;;  %v467_v25 = vld [vmem:[%s854_s2] ss:$0 sm:$0xff]  ;;  %v614_v36 = vld [vmem:[#allocation8 + $0x8] sm:$0xff]   ;;  %v615_v37 = vld [vmem:[#allocation8] sm:$0xff]  }
  0x3d   :  { %v613_v35 = vld [vmem:[#allocation8 + $0x10] sm:$0xff]  }
  0x3e   :  { %v476_v38 = vld [vmem:[%s856_s4] ss:$0 sm:$0xff]  ;;  %s742_s4 = smov [#allocation10]  }
  0x3f   :  { %526 = vmatpush3.bf16.msra.mxu0 %v594_v3  ;;  %546 = vmatpush3.bf16.msra.mxu1 %v602_v8  ;;  %v485_v48 = vld [vmem:[%s858_s6] ss:$0 sm:$0xff]  ;;  %s453_s6 = sshll.u32 %s742_s4, 4  ;;  %s454_s6 = int_to_ptr.vmem [resolvable:$true] %s453_s6 }
  0x40   :  { %527 = vmatprep.subr.bf16.mxu0 %v740_v0  ;;  %547 = vmatprep.subr.bf16.mxu1 %v740_v0  ;;  %s704_s26 = scalar_lea.vmem %s454_s6, 256  ;;  %p709_p7 = scmp.lt.s32.totalorder %s454_s6, %s454_s6 }
  0x41   :  { %p705_p6 = scmp.ne.s32.totalorder %s454_s6, %s704_s26  ;;  %p710_p8 = scmp.lt.s32.totalorder %s704_s26, %s704_s26 }
  0x43   :  { %528 = vmatpush3.bf16.msra.mxu0 %v595_v5  ;;  %548 = vmatpush3.bf16.msra.mxu1 %v603_v10  ;;  %p711_p9 = por %p710_p8, %p709_p7 }
  0x44   :  { %529 = vmatprep.subr.bf16.mxu0 %v740_v0  ;;  %549 = vmatprep.subr.bf16.mxu1 %v740_v0 }
  0x45   :  { %p712_p10 = pnand %p711_p9, %p705_p6 }
  0x47   :  { %530 = vmatpush3.bf16.msra.mxu0 %v596_v7  ;;  %550 = vmatpush3.bf16.msra.mxu1 %v604_v12 }
  0x48   :  { %531 = vmatprep.subr.bf16.mxu0 %v740_v0  ;;  %551 = vmatprep.subr.bf16.mxu1 %v740_v0 }
  0x4b   :  { %532 = vmatpush3.bf16.msra.mxu0 %v597_v9  ;;  %552 = vmatpush3.bf16.msra.mxu1 %v605_v17 }
  0x4c   :  { %533 = vmatprep.subr.bf16.mxu0 %v740_v0  ;;  %553 = vmatprep.subr.bf16.mxu1 %v740_v0 }
  0x4f   :  { %534 = vmatpush3.bf16.msra.mxu0 %v598_v11  ;;  %554 = vmatpush3.bf16.msra.mxu1 %v606_v18 }
  0x50   :  { %535 = vmatprep.subr.bf16.mxu0 %v740_v0  ;;  %555 = vmatprep.subr.bf16.mxu1 %v740_v0 }
  0x53   :  { %536 = vmatpush3.bf16.msra.mxu0 %v599_v13  ;;  %556 = vmatpush3.bf16.msra.mxu1 %v607_v19 }
  0x54   :  { %561 = vmatprep.subr.bf16.mxu0 %v740_v0 }
  0x56   :  { %538 = vmatmul.mubr.bf16.vlgmr.msra.gmra.mxu0 %v102_v16 }
  0x57   :  { %577 = vmatprep.mubr.msk.bf16.mxu0 %vm741_vm0, %v740_v0  ;;  %562 = vmatpush3.bf16.msra.mxu0 %v608_v20 }
  0x58   :  { %563 = vmatprep.subr.bf16.mxu0 %v740_v0 }
  0x5b   :  { %564 = vmatpush3.bf16.msra.mxu0 %v609_v21 }
  0x5c   :  { %565 = vmatprep.subr.bf16.mxu0 %v740_v0 }
  0x5f   :  { %566 = vmatpush3.bf16.msra.mxu0 %v610_v22 }
  0x60   :  { %567 = vmatprep.subr.bf16.mxu0 %v740_v0 }
  0x63   :  { %568 = vmatpush3.bf16.msra.mxu0 %v611_v23 }
  0x64   :  { %569 = vmatprep.subr.bf16.mxu0 %v740_v0 }
  0x67   :  { %570 = vmatpush3.bf16.msra.mxu0 %v612_v24 }
  0x68   :  { %571 = vmatprep.subr.bf16.mxu0 %v740_v0 }
  0x6b   :  { %572 = vmatpush3.bf16.msra.mxu0 %v613_v35 }
  0x6c   :  { %573 = vmatprep.subr.bf16.mxu0 %v740_v0 }
  0x6f   :  { %574 = vmatpush3.bf16.msra.mxu0 %v614_v36 }
  0x70   :  { %575 = vmatprep.subr.bf16.mxu0 %v740_v0 }
  0x73   :  { %576 = vmatpush3.bf16.msra.mxu0 %v615_v37 }
 0x116   :  { %v191_v26 = vpop.f32.mrf.mxu0 }
 0x117   :  { %v192_v28 = vadd.f32 %v467_v25, %v191_v26 }
 0x118   :  { %v539_v27 = vpop.f32.mrf.mxu0 }
 0x119   :  { %v198_v32 = vmax.f32 %v192_v28, 0.0 }
 0x11a   :  { %v194_v29 = vpop.f32.mrf.mxu0 }
 0x11b   :  { %v195_v30 = vadd.f32 %v467_v25, %v194_v29 }
 0x11c   :  { %v540_v31 = vpop.f32.mrf.mxu0 }
 0x11d   :  { %v199_v33 = vmax.f32 %v195_v30, 0.0 }
 0x11f   :  { %v217_v34 = vpack.c.bf16 %v199_v33, %v198_v32 }
 0x121   :  { %558 = vmatmul.mubr.bf16.vlgmr.msra.gmra.mxu1 %v217_v34 }
 0x1e1   :  { %v306_v39 = vpop.f32.mrf.mxu1 }
 0x1e2   :  { %v307_v41 = vadd.f32 %v476_v38, %v306_v39 }
 0x1e3   :  { %v559_v40 = vpop.f32.mrf.mxu1 }
 0x1e4   :  { %v313_v45 = vmax.f32 %v307_v41, 0.0 }
 0x1e5   :  { %v309_v42 = vpop.f32.mrf.mxu1 }
 0x1e6   :  { %v310_v43 = vadd.f32 %v476_v38, %v309_v42 }
 0x1e7   :  { %v560_v44 = vpop.f32.mrf.mxu1 }
 0x1e8   :  { %v314_v46 = vmax.f32 %v310_v43, 0.0 }
 0x1ea   :  { %v332_v47 = vpack.c.bf16 %v314_v46, %v313_v45 }
 0x1ec   :  { %578 = vmatmul.mubr.bf16.vlgmr.msra.gmra.mxu0 %v332_v47 }
 0x2ac   :  { %v421_v49 = vpop.f32.mrf.mxu0 }
 0x2ad   :  { %v422_v50 = vadd.f32 %v485_v48, %v421_v49 }
 0x2ae   :  { %v579_v51 = vpop.f32.mrf.mxu0 }
 0x2af   :  { %428 = vmax.xlane.f32.xlu0 %v422_v50 }
 0x2b0   :  { %v424_v52 = vpop.f32.mrf.mxu0 }
 0x2b1   :  { %v425_v53 = vadd.f32 %v485_v48, %v424_v52 }
 0x2b2   :  { %v580_v54 = vpop.f32.mrf.mxu0 }
 0x2b3   :  { %430 = vmax.xlane.f32.xlu0 %v425_v53 }
 0x338   :  { %v429_v55 = vpop.xlane.xlu0 %428 }
 0x339   :  { %v432_v56 = vsub.f32 %v422_v50, %v429_v55 }
 0x33b   :  { %v434_v57 = vmul.f32 1.442695, %v432_v56 }
 0x33c   :  { %v431_v58 = vpop.xlane.xlu0 %430 }
 0x33d   :  { %616 = vpow2.f32 %v434_v57  ;;  %v433_v59 = vsub.f32 %v425_v53, %v431_v58 }
 0x33f   :  { %v436_v60 = vmul.f32 1.442695, %v433_v59 }
 0x341   :  { %618 = vpow2.f32 %v436_v60 }
 0x34a   :  { %v617_v61 = vpop.eup %616 }
 0x34b   :  { %438 = vadd.xlane.f32.xlu1 %v617_v61 }
 0x34e   :  { %v619_v62 = vpop.eup %618 }
 0x34f   :  { %440 = vadd.xlane.f32.xlu1 %v619_v62 }
 0x3d4   :  { %v439_v63 = vpop.xlane.xlu1 %438 }
 0x3d5   :  { %620 = vrcp.f32 %v439_v63 }
 0x3d8   :  { %v441_v0 = vpop.xlane.xlu1 %440 }
 0x3d9   :  { %622 = vrcp.f32 %v441_v0 }
 0x3e2   :  { %v621_v1 = vpop.eup %620 }
 0x3e3   :  { %v443_v2 = vmul.f32 %v621_v1, %v617_v61 }
 0x3e5   :  { %446 = vst [vmem:[#allocation10] sm:$0xff] %v443_v2 }
 0x3e6   :  { %v623_v3 = vpop.eup %622 }
 0x3e7   :  { %v445_v4 = vmul.f32 %v623_v3, %v619_v62 }
 0x3e9   :  { %447 = vst [vmem:[#allocation10 + $0x8] sm:$0xff] %v445_v4 }
 0x3ea   :  { %715 = shalt.err (!%p712_p10)
}
 0x3eb   :  { %459 = dma.vmem_to_hbm [thread:$0]  %s454_s6, 256, %s859_s7, [#allocation4], %s736_s11, %s736_s11, %s737_s12  }
 0x3ec   :  { %730 = dma.done.wait [#allocation4], 256  }
 0x3ed   :  { %731 = vsyncadd [#allocation4], 4294967040 }
 0x3ee   :  { %463 = vsyncpa [#allocation3], 1 }
 0x3ef   :  { %464 = vsyncpa [#allocation6], 1 }
 0x3f0   :  { %465 = vsyncpa [#allocation9], 1 }
 0x3f1   :  { %466 = vsyncpa [#allocation4], 1 }

</bundles_post_ra>
